<compile_context>
chip_gen: v7x
topology: tpu7x:2x2x1
jax: 0.10.0
libtpu: 0.0.40
codegen_flags: <defaults>
</compile_context>

<pallas_src>
import functools

import numpy as np
import jax
import jax.numpy as jnp
from jax.experimental import pallas as pl
from jax.experimental.pallas import tpu as pltpu


# ----------------------------------------------------------------------------
# Host-side anchor ranking (exact replica of the torch reference math)
# ----------------------------------------------------------------------------
def anchor_rank_host(anchors, anchor_areas, input_image_size, eps=1e-5):
    """NumPy replica of anchor_rank(): IoU + diag shape-IoU + first-max argmax."""
    H = float(input_image_size[0])
    W = float(input_image_size[1])
    x1, y1, x2, y2 = anchors[:, 0], anchors[:, 1], anchors[:, 2], anchors[:, 3]
    area1 = anchor_areas

    # IoU(anchor_i, full-image box [0, 0, W, H])
    lt_x = np.maximum(x1, 0.0)
    lt_y = np.maximum(y1, 0.0)
    rb_x = np.minimum(x2, W)
    rb_y = np.minimum(y2, H)
    inter = np.clip(rb_x - lt_x, 0.0, None) * np.clip(rb_y - lt_y, 0.0, None)
    iou = inter / (area1 + W * H - inter + eps)

    # shape IoU diag: boxes3_i = [x1, y1, x2, trunc(H/W * x2)]
    # (torch assigns the float ratio into an int64 tensor -> trunc toward zero)
    b3_y2 = np.trunc(H / W * x2)
    s_inter = (np.clip(x2 - x1, 0.0, None)
               * np.clip(np.minimum(y2, b3_y2) - y1, 0.0, None))
    area3 = (x2 - x1) * (b3_y2 - y1)
    shape_iou = s_inter / (area1 + area3 - s_inter + eps)

    return int(np.argmax(shape_iou * 100.0 + iou))


# ----------------------------------------------------------------------------
# Host-side interpolation-matrix construction (align_corners=False, no AA)
# ----------------------------------------------------------------------------
def _bilinear_matrix_np(out_size, in_size, padded_out):
    """Dense bilinear interp matrix, shape (padded_out, in_size), float32.

    Rows >= out_size are zero (padding; sliced off after the kernel).
    """
    i = np.arange(out_size, dtype=np.float64)
    scale = in_size / out_size
    src = np.maximum((i + 0.5) * scale - 0.5, 0.0)
    i0 = np.minimum(np.floor(src).astype(np.int64), in_size - 1)
    i1 = np.minimum(i0 + 1, in_size - 1)
    lam = src - i0
    m = np.zeros((padded_out, in_size), np.float64)
    rows = np.arange(out_size)
    np.add.at(m, (rows, i0), 1.0 - lam)
    np.add.at(m, (rows, i1), lam)
    return m.astype(np.float32)


# ----------------------------------------------------------------------------
# Pallas kernel: per output tile, 2 MXU matmuls per channel (C unrolled)
# ----------------------------------------------------------------------------
def _resize_kernel(wy_ref, img_ref, wxt_ref, out_ref, *, row_first):
    wy = wy_ref[...]       # (th, Hi)
    wxt = wxt_ref[...]     # (Wi, tw)
    n_c = out_ref.shape[0]
    for c in range(n_c):   # static unroll, C is tiny (3)
        img_c = img_ref[c]                                  # (Hi, Wi), wdtype
        if row_first:
            tmp = jnp.dot(wy, img_c, preferred_element_type=jnp.float32)   # (th, Wi)
            out = jnp.dot(tmp.astype(wxt.dtype), wxt,
                          preferred_element_type=jnp.float32)              # (th, tw)
        else:
            tmp = jnp.dot(img_c, wxt, preferred_element_type=jnp.float32)  # (Hi, tw)
            out = jnp.dot(wy, tmp.astype(wy.dtype),
                          preferred_element_type=jnp.float32)              # (th, tw)
        out_ref[c] = out.astype(out_ref.dtype)


# ----------------------------------------------------------------------------
# Tiling helpers
# ----------------------------------------------------------------------------
def _round_up(x, m):
    return ((x + m - 1) // m) * m


def _pad_and_tile(size, align, cap):
    """Pad `size` for alignment; return (padded, tile) with tile | padded."""
    padded = _round_up(size, align)
    if padded <= cap:
        return padded, padded
    padded = _round_up(size, cap)
    return padded, cap


@functools.lru_cache(maxsize=None)
def _vmem_limit_bytes():
    """~0.75x of this generation's per-core VMEM (48 MiB on v7x, 96 MiB v5e/v6e)."""
    try:
        cap = int(pltpu.get_tpu_info().vmem_capacity_bytes)
    except Exception:  # pragma: no cover — conservative fallback
        cap = 64 * 1024 * 1024
    return max(16 * 1024 * 1024, (cap * 3) // 4)


# ----------------------------------------------------------------------------
# Per-size compiled resize function (cached); weights live on device once.
# ----------------------------------------------------------------------------
@functools.lru_cache(maxsize=None)
def _build_resize_fn(C, Hi, Wi, out_h, out_w, use_bf16, img_dtype_name):
    img_dtype = jnp.dtype(img_dtype_name)
    wdtype = jnp.bfloat16 if use_bf16 else jnp.float32
    wbytes = 2 if use_bf16 else 4
    obytes = img_dtype.itemsize

    vmem_limit = _vmem_limit_bytes()
    budget = vmem_limit // 2          # headroom for Mosaic internal scratch

    align_h = 16 if use_bf16 else 8   # sublane-dense for the weight dtype
    align_w = 128

    # Choose output tiles so the double-buffered block footprint fits budget.
    cap_h, cap_w = 512, 512
    while True:
        ho_p, th = _pad_and_tile(out_h, align_h, cap_h)
        wo_p, tw = _pad_and_tile(out_w, align_w, cap_w)
        fp = (2 * (th * Hi + Wi * tw + C * Hi * Wi) * wbytes
              + 2 * C * th * tw * obytes)
        if fp <= budget or (cap_h <= align_h and cap_w <= align_w):
            break
        if th * Hi >= tw * Wi and cap_h > align_h:
            cap_h = max(align_h, cap_h // 2)
        elif cap_w > align_w:
            cap_w = max(align_w, cap_w // 2)
        else:
            cap_h = max(align_h, cap_h // 2)
    # TODO(synk): if C*Hi*Wi alone exceeds the budget (very large photos), the
    #             image block itself needs reduction tiling / a banded-interp
    #             gather path; out of scope for these sizes.

    # Static matmul-order choice (per-tile MAC count).
    flops_row_first = th * Hi * Wi + th * Wi * tw
    flops_col_first = Hi * Wi * tw + th * Hi * tw
    row_first = flops_row_first <= flops_col_first

    # Host-built interp matrices, zero-padded to lane/sublane-aligned sizes.
    wy_np = _bilinear_matrix_np(out_h, Hi, ho_p)                       # (Ho_p, Hi)
    wxt_np = np.ascontiguousarray(_bilinear_matrix_np(out_w, Wi, wo_p).T)  # (Wi, Wo_p)
    wy = jnp.asarray(wy_np, dtype=wdtype)
    wxt = jnp.asarray(wxt_np, dtype=wdtype)

    grid = (ho_p // th, wo_p // tw)
    wy_spec = pl.BlockSpec((th, Hi), lambda i, j: (i, 0))
    wxt_spec = pl.BlockSpec((Wi, tw), lambda i, j: (0, j))
    out_spec = pl.BlockSpec((C, th, tw), lambda i, j: (0, i, j))

    # Constant-index image block: drop to a single buffer once it is large
    # enough to matter (never re-DMA'd, so double-buffering is pure VMEM waste).
    img_block_bytes = C * Hi * Wi * wbytes
    if img_block_bytes > 2 * 1024 * 1024 and grid[0] * grid[1] > 1:
        img_spec = pl.BlockSpec((C, Hi, Wi), lambda i, j: (0, 0, 0),
                                pipeline_mode=pl.Buffered(1))
    else:
        img_spec = pl.BlockSpec((C, Hi, Wi), lambda i, j: (0, 0, 0))

    resize_p = pl.pallas_call(
        functools.partial(_resize_kernel, row_first=row_first),
        out_shape=jax.ShapeDtypeStruct((C, ho_p, wo_p), img_dtype),
        grid=grid,
        in_specs=[wy_spec, img_spec, wxt_spec],
        out_specs=out_spec,
        compiler_params=pltpu.CompilerParams(
            dimension_semantics=("parallel", "parallel"),
            vmem_limit_bytes=vmem_limit),
    )

    @functools.partial(jax.jit, static_argnums=(3,))
    def run(wy_a, wxt_a, img_f, crop):
        img_w = img_f.astype(wdtype)       # cast once, outside the kernel
        out_p = resize_p(wy_a, img_w, wxt_a)
        if crop and (ho_p != out_h or wo_p != out_w):
            out_p = out_p[:, :out_h, :out_w]
        return out_p

    return lambda img_f, crop=True: run(wy, wxt, img_f, crop)


def bilinear_resize_pallas(img, out_h, out_w, use_bf16=True, crop=True):
    """Bilinear (align_corners=False, antialias=False) resize of a (C,H,W) image."""
    C, Hi, Wi = img.shape
    fn = _build_resize_fn(int(C), int(Hi), int(Wi), int(out_h), int(out_w),
                          bool(use_bf16), jnp.dtype(img.dtype).name)
    return fn(img, crop)


# ----------------------------------------------------------------------------
# Module-equivalent wrapper
# ----------------------------------------------------------------------------
class AnchorResize:
    def __init__(self, image_size, anchors, use_bf16=True):
        # anchors: list of (h_mult, w_mult); anchor box = [0, 0, w*W0, h*H0]
        # Kept host-side (NumPy) so ranking + target-size lookup never touch
        # the device.
        self.image_size = image_size
        # bf16 MXU operands (f32 accumulation) by default: ~1e-3 drift vs f32,
        # ~3x faster matmuls on v5e and halved weight DMA/VMEM everywhere.
        self.use_bf16 = use_bf16
        self.anchors_np = np.array(
            [[0.0, 0.0, float(a[1] * image_size[1]), float(a[0] * image_size[0])]
             for a in anchors], dtype=np.float64)
        self.anchor_areas_np = ((self.anchors_np[:, 2] - self.anchors_np[:, 0])
                                * (self.anchors_np[:, 3] - self.anchors_np[:, 1]))

    def warmup(self, img_shape, dtype=jnp.float32):
        """Pre-compile the resize kernel for every anchor target size."""
        dummy = jnp.zeros(img_shape, dtype)
        for a in self.anchors_np:
            tw, th = int(a[2]), int(a[3])
            jax.block_until_ready(
                bilinear_resize_pallas(dummy, th, tw, self.use_bf16))

    def __call__(self, img, skip_resize=False):
        # img: (C, H, W) float device array
        _, H, W = img.shape
        sel_idx = anchor_rank_host(self.anchors_np, self.anchor_areas_np, (H, W))
        if skip_resize:
            return sel_idx
        # target_size = anchors[sel][2:] = [w, h]; resize to (h, w)
        target_w = int(self.anchors_np[sel_idx, 2])
        target_h = int(self.anchors_np[sel_idx, 3])
        resized = bilinear_resize_pallas(img, target_h, target_w, self.use_bf16)
        return resized, sel_idx


# ----------------------------------------------------------------------------
# Independent reference (gather + lerp, float64) for correctness checks
# ----------------------------------------------------------------------------
def _reference_resize_np(img, out_h, out_w):
    C, Hi, Wi = img.shape

    def coords(o, n):
        src = np.maximum((np.arange(o, dtype=np.float64) + 0.5) * (n / o) - 0.5, 0.0)
        i0 = np.minimum(np.floor(src).astype(np.int64), n - 1)
        i1 = np.minimum(i0 + 1, n - 1)
        return i0, i1, src - i0

    y0, y1, ly = coords(out_h, Hi)
    x0, x1, lx = coords(out_w, Wi)
    out = np.empty((C, out_h, out_w), np.float64)
    for c in range(C):
        p = img[c]
        out[c] = (p[np.ix_(y0, x0)] * (1 - ly)[:, None] * (1 - lx)[None, :]
                  + p[np.ix_(y0, x1)] * (1 - ly)[:, None] * lx[None, :]
                  + p[np.ix_(y1, x0)] * ly[:, None] * (1 - lx)[None, :]
                  + p[np.ix_(y1, x1)] * ly[:, None] * lx[None, :])
    return out


if __name__ == "__main__":
    key = jax.random.PRNGKey(0)

    image_size = (16, 16)                      # base tile size (H0, W0)
    anchor_grid = [(1, 1), (1, 2), (2, 1), (2, 2)]
    resizer = AnchorResize(image_size, anchor_grid)          # bf16 default

    # small input image, CHW layout
    img = jax.random.uniform(key, (3, 24, 40), dtype=jnp.float32)

    # Pre-warm the compile cache for all anchor target sizes at this input shape.
    resizer.warmup(img.shape)

    resized, selected = resizer(img)
    resized = jax.block_until_ready(resized)

    # sanity: output spatial size must match the selected anchor (h, w)
    exp_w = int(resizer.anchors_np[selected, 2])
    exp_h = int(resizer.anchors_np[selected, 3])
    assert resized.shape == (3, exp_h, exp_w), resized.shape

    # correctness: compare against an independent float64 gather-lerp reference
    img_np = np.asarray(img, dtype=np.float64)
    ref = _reference_resize_np(img_np, exp_h, exp_w)

    # bf16-operand path (default): bounded drift
    np.testing.assert_allclose(np.asarray(resized, np.float64), ref,
                               atol=2e-2, rtol=0)

    # f32 path: (near-)exact
    exact = jax.block_until_ready(
        bilinear_resize_pallas(img, exp_h, exp_w, use_bf16=False))
    np.testing.assert_allclose(np.asarray(exact, np.float64), ref,
                               atol=1e-5, rtol=0)

    # bilinear interp of values in [0,1) must stay in [0,1] and be finite
    assert bool(jnp.isfinite(resized).all())
    assert float(resized.min()) >= -2e-2 and float(resized.max()) <= 1.0 + 2e-2

    print("KERNEL_OK")
</pallas_src>

<mosaic_0001>
module attributes {stable_mosaic.version = 11 : i64} {
  func.func @_resize_kernel(%arg0: i32, %arg1: i32, %arg2: memref<16x24xbf16, #tpu.memory_space<vmem>>, %arg3: memref<3x24x40xbf16, #tpu.memory_space<vmem>>, %arg4: memref<40x128xbf16, #tpu.memory_space<vmem>>, %arg5: memref<3x16x128xf32, #tpu.memory_space<vmem>>) attributes {dimension_semantics = [#tpu.dimension_semantics<parallel>, #tpu.dimension_semantics<parallel>], iteration_bounds = array<i64: 1, 1>, scalar_prefetch = 0 : i64, scratch_operands = 0 : i64, tpu.core_type = #tpu.core_type<tc>, window_params = [{transform_indices = @transform_0, window_bounds = array<i64: 16, 24>}, {pipeline_mode = #tpu.pipeline_mode<synchronous>, transform_indices = @transform_1, window_bounds = array<i64: 3, 24, 40>}, {transform_indices = @transform_2, window_bounds = array<i64: 40, 128>}, {transform_indices = @transform_3, window_bounds = array<i64: 3, 16, 128>}]} {
    %c0 = arith.constant 0 : index
    %c0_0 = arith.constant 0 : index
    %0 = vector.load %arg2[%c0, %c0_0] : memref<16x24xbf16, #tpu.memory_space<vmem>>, vector<16x24xbf16>
    %c0_1 = arith.constant 0 : index
    %c0_2 = arith.constant 0 : index
    %1 = vector.load %arg4[%c0_1, %c0_2] : memref<40x128xbf16, #tpu.memory_space<vmem>>, vector<40x128xbf16>
    %c0_3 = arith.constant 0 : index
    %c0_4 = arith.constant 0 : index
    %c0_5 = arith.constant 0 : index
    %2 = vector.load %arg3[%c0_3, %c0_4, %c0_5] : memref<3x24x40xbf16, #tpu.memory_space<vmem>>, vector<1x24x40xbf16>
    %3 = vector.shape_cast %2 : vector<1x24x40xbf16> to vector<24x40xbf16>
    %cst = arith.constant dense<0.000000e+00> : vector<16x40xf32>
    %4 = tpu.matmul %0, %3, %cst {dimension_numbers = #tpu.dot_dimension_numbers<[1], [0], [0], [1], [0, 0, 1, 1], [], []>} : vector<16x24xbf16>, vector<24x40xbf16>, vector<16x40xf32> -> vector<16x40xf32>
    %5 = arith.truncf %4 : vector<16x40xf32> to vector<16x40xbf16>
    %cst_6 = arith.constant dense<0.000000e+00> : vector<16x128xf32>
    %6 = tpu.matmul %5, %1, %cst_6 {dimension_numbers = #tpu.dot_dimension_numbers<[1], [0], [0], [1], [0, 0, 1, 1], [], []>} : vector<16x40xbf16>, vector<40x128xbf16>, vector<16x128xf32> -> vector<16x128xf32>
    %c0_7 = arith.constant 0 : index
    %c0_8 = arith.constant 0 : index
    %c0_9 = arith.constant 0 : index
    %7 = vector.load %arg5[%c0_7, %c0_8, %c0_9] : memref<3x16x128xf32, #tpu.memory_space<vmem>>, vector<1x16x128xf32>
    %8 = vector.shape_cast %7 : vector<1x16x128xf32> to vector<16x128xf32>
    %9 = vector.shape_cast %6 : vector<16x128xf32> to vector<1x16x128xf32>
    tpu.vector_store %arg5[%c0_7, %c0_8, %c0_9], %9 {strides = array<i32>} : memref<3x16x128xf32, #tpu.memory_space<vmem>>, vector<1x16x128xf32>,
    %c1 = arith.constant 1 : index
    %c0_10 = arith.constant 0 : index
    %c0_11 = arith.constant 0 : index
    %10 = vector.load %arg3[%c1, %c0_10, %c0_11] : memref<3x24x40xbf16, #tpu.memory_space<vmem>>, vector<1x24x40xbf16>
    %11 = vector.shape_cast %10 : vector<1x24x40xbf16> to vector<24x40xbf16>
    %cst_12 = arith.constant dense<0.000000e+00> : vector<16x40xf32>
    %12 = tpu.matmul %0, %11, %cst_12 {dimension_numbers = #tpu.dot_dimension_numbers<[1], [0], [0], [1], [0, 0, 1, 1], [], []>} : vector<16x24xbf16>, vector<24x40xbf16>, vector<16x40xf32> -> vector<16x40xf32>
    %13 = arith.truncf %12 : vector<16x40xf32> to vector<16x40xbf16>
    %cst_13 = arith.constant dense<0.000000e+00> : vector<16x128xf32>
    %14 = tpu.matmul %13, %1, %cst_13 {dimension_numbers = #tpu.dot_dimension_numbers<[1], [0], [0], [1], [0, 0, 1, 1], [], []>} : vector<16x40xbf16>, vector<40x128xbf16>, vector<16x128xf32> -> vector<16x128xf32>
    %c1_14 = arith.constant 1 : index
    %c0_15 = arith.constant 0 : index
    %c0_16 = arith.constant 0 : index
    %15 = vector.load %arg5[%c1_14, %c0_15, %c0_16] : memref<3x16x128xf32, #tpu.memory_space<vmem>>, vector<1x16x128xf32>
    %16 = vector.shape_cast %15 : vector<1x16x128xf32> to vector<16x128xf32>
    %17 = vector.shape_cast %14 : vector<16x128xf32> to vector<1x16x128xf32>
    tpu.vector_store %arg5[%c1_14, %c0_15, %c0_16], %17 {strides = array<i32>} : memref<3x16x128xf32, #tpu.memory_space<vmem>>, vector<1x16x128xf32>,
    %c2 = arith.constant 2 : index
    %c0_17 = arith.constant 0 : index
    %c0_18 = arith.constant 0 : index
    %18 = vector.load %arg3[%c2, %c0_17, %c0_18] : memref<3x24x40xbf16, #tpu.memory_space<vmem>>, vector<1x24x40xbf16>
    %19 = vector.shape_cast %18 : vector<1x24x40xbf16> to vector<24x40xbf16>
    %cst_19 = arith.constant dense<0.000000e+00> : vector<16x40xf32>
    %20 = tpu.matmul %0, %19, %cst_19 {dimension_numbers = #tpu.dot_dimension_numbers<[1], [0], [0], [1], [0, 0, 1, 1], [], []>} : vector<16x24xbf16>, vector<24x40xbf16>, vector<16x40xf32> -> vector<16x40xf32>
    %21 = arith.truncf %20 : vector<16x40xf32> to vector<16x40xbf16>
    %cst_20 = arith.constant dense<0.000000e+00> : vector<16x128xf32>
    %22 = tpu.matmul %21, %1, %cst_20 {dimension_numbers = #tpu.dot_dimension_numbers<[1], [0], [0], [1], [0, 0, 1, 1], [], []>} : vector<16x40xbf16>, vector<40x128xbf16>, vector<16x128xf32> -> vector<16x128xf32>
    %c2_21 = arith.constant 2 : index
    %c0_22 = arith.constant 0 : index
    %c0_23 = arith.constant 0 : index
    %23 = vector.load %arg5[%c2_21, %c0_22, %c0_23] : memref<3x16x128xf32, #tpu.memory_space<vmem>>, vector<1x16x128xf32>
    %24 = vector.shape_cast %23 : vector<1x16x128xf32> to vector<16x128xf32>
    %25 = vector.shape_cast %22 : vector<16x128xf32> to vector<1x16x128xf32>
    tpu.vector_store %arg5[%c2_21, %c0_22, %c0_23], %25 {strides = array<i32>} : memref<3x16x128xf32, #tpu.memory_space<vmem>>, vector<1x16x128xf32>,
    return
  }
  func.func @transform_0(%arg0: i32, %arg1: i32) -> (i32, i32) {
    %c0_i32 = arith.constant 0 : i32
    %c0_i32_0 = arith.constant 0 : i32
    return %arg0, %c0_i32 : i32, i32
  }
  func.func @transform_1(%arg0: i32, %arg1: i32) -> (i32, i32, i32) {
    %c0_i32 = arith.constant 0 : i32
    %c0_i32_0 = arith.constant 0 : i32
    %c0_i32_1 = arith.constant 0 : i32
    %c0_i32_2 = arith.constant 0 : i32
    return %c0_i32, %c0_i32_0, %c0_i32_1 : i32, i32, i32
  }
  func.func @transform_2(%arg0: i32, %arg1: i32) -> (i32, i32) {
    %c0_i32 = arith.constant 0 : i32
    %c0_i32_0 = arith.constant 0 : i32
    return %c0_i32, %arg1 : i32, i32
  }
  func.func @transform_3(%arg0: i32, %arg1: i32) -> (i32, i32, i32) {
    %c0_i32 = arith.constant 0 : i32
    %c0_i32_0 = arith.constant 0 : i32
    return %c0_i32, %arg0, %arg1 : i32, i32, i32
  }
}

</mosaic_0001>

<bundles_post_ra>
// kernel: run.1
= control target key start
LH: loop header
LB: loop body
LE: loop exit
PB: predicated region body
PF: predicated region fallthrough
CT: control target
= control target key end

     0   :  { %v517_v1 = vmov 0.0   ;;  %vm44_vm0 = vcmask 1043456   ;;  %vm518_vm1 = vmmov 0   ;;  %vm40_vm2 = vcmask 195584   ;;  %s621_s0 = inlined_call_operand.vmem [shape: bf16[16,24], index: 0, kind: input, shape index: {}]   ;;  %s622_s1 = inlined_call_operand.vmem [shape: bf16[3,24,40], index: 1, kind: input, shape index: {}]   ;;  %s623_s2 = inlined_call_operand.vmem [shape: bf16[40,128], index: 2, kind: input, shape index: {}]   ;;  %s624_s3 = inlined_call_operand.hbm [shape: f32[3,16,128], index: 3, kind: output, shape index: {}]  }
   0x1   :  { %v483_v0 = vld [vmem:[%s622_s1] sm:$0xff]   ;;  %424 = vmatprep.subr.bf16.mxu1 %v517_v1  ;;  %442 = vmatprep.subr.bf16.mxu0 %v517_v1  ;;  %v484_v2 = vld [vmem:[%s622_s1 + $0xc] sm:$0xff]   ;;  %v485_v3 = vld [vmem:[%s622_s1 + $0x8] ss:$0 sps:$4 sm:$0xff]  }
   0x2   :  { %425 = vmatpush3.bf16.msra.mxu1 %v483_v0  ;;  %443 = vmatpush3.bf16.msra.mxu0 %v484_v2  ;;  %v486_v4 = vld [vmem:[%s622_s1 + $0x14] ss:$0 sps:$4 sm:$0xff]   ;;  %v46_v5 = vsel %vm44_vm0, %v485_v3, 0  ;;  %v487_v7 = vld [vmem:[%s621_s0] sm:$0xff]   ;;  %v488_v8 = vld [vmem:[%s622_s1 + $0x18] sm:$0xff]  }
   0x3   :  { %426 = vmatprep.subr.bf16.mxu1 %v517_v1  ;;  %444 = vmatprep.subr.bf16.mxu0 %v517_v1  ;;  %v169_v6 = vsel %vm44_vm0, %v486_v4, 0  ;;  %v490_v9 = vld [vmem:[%s623_s2] sm:$0xff]  }
   0x4   :  { %428 = vmatprep.mubr.msk.bf16.mxu1 %vm518_vm1, %v517_v1  ;;  %446 = vmatprep.mubr.msk.bf16.mxu0 %vm518_vm1, %v517_v1  ;;  %v489_v10 = vld [vmem:[%s622_s1 + $0x20] ss:$0 sps:$4 sm:$0xff]  }
   0x6   :  { %427 = vmatpush3.bf16.msra.mxu1 %v46_v5  ;;  %445 = vmatpush3.bf16.msra.mxu0 %v169_v6 }
   0x7   :  { %432 = vmatprep.subr.bf16.mxu1 %v517_v1  ;;  %460 = vmatprep.subr.bf16.mxu0 %v517_v1 }
   0x8   :  { %8 = vsyncpa [#allocation3], 0  ;;  %v491_v11 = vld [vmem:[%s623_s2 + $0x8] sm:$0xff]   ;;  %v274_v12 = vsel %vm44_vm0, %v489_v10, 0  ;;  %v492_v13 = vld [vmem:[%s623_s2 + $0x10] ss:$0 sps:$4 sm:$0xff]  }
   0x9   :  { %429 = vmatmul.mubr.msk.bf16.vlgmr.msra.gmra.mrb[0].mxu1 %vm40_vm2, %v487_v7  ;;  %447 = vmatmul.mubr.msk.bf16.vlgmr.msra.gmra.mrb[0].mxu0 %vm40_vm2, %v487_v7  ;;  %v110_v14 = vsel %vm44_vm0, %v492_v13, 0  ;;  %vm105_vm3 = vcmask 326656   ;;  %s519_s2 = smov [#allocation2]  }
   0xa   :  { %433 = vmatpush3.bf16.msra.mxu1 %v490_v9  ;;  %461 = vmatpush3.bf16.msra.mxu0 %v488_v8  ;;  %s370_s30 = sshll.u32 %s519_s2, 4  ;;  %s371_s30 = int_to_ptr.vmem [resolvable:$true] %s370_s30 }
   0xb   :  { %464 = vmatprep.mubr.msk.bf16.mxu0 %vm518_vm1, %v517_v1  ;;  %462 = vmatprep.subr.bf16.mxu0 %v517_v1  ;;  %s493_s4 = scalar_lea.vmem %s371_s30, 768  ;;  %p498_p1 = scmp.lt.s32.totalorder %s371_s30, %s371_s30 }
   0xc   :  { %434 = vmatprep.subr.bf16.mxu1 %v517_v1  ;;  %438 = vmatprep.mubr.msk.bf16.mxu1 %vm518_vm1, %v517_v1  ;;  %p494_p0 = scmp.ne.s32.totalorder %s371_s30, %s493_s4  ;;  %p499_p2 = scmp.lt.s32.totalorder %s493_s4, %s493_s4 }
   0xe   :  { %435 = vmatpush3.bf16.msra.mxu1 %v491_v11  ;;  %463 = vmatpush3.bf16.msra.mxu0 %v274_v12  ;;  %p500_p3 = por %p499_p2, %p498_p1 }
   0xf   :  { %436 = vmatprep.subr.bf16.mxu1 %v517_v1  ;;  %468 = vmatprep.subr.bf16.mxu0 %v517_v1 }
  0x10   :  { %p501_p4 = pnand %p500_p3, %p494_p0 }
  0x11   :  { %465 = vmatmul.mubr.msk.bf16.vlgmr.msra.gmra.mrb[4].mxu0 %vm40_vm2, %v487_v7 }
  0x12   :  { %469 = vmatpush3.bf16.msra.mxu0 %v490_v9  ;;  %474 = vmatprep.mubr.msk.bf16.mxu0 %vm518_vm1, %v517_v1 }
  0x13   :  { %470 = vmatprep.subr.bf16.mxu0 %v517_v1  ;;  %437 = vmatpush3.bf16.msra.mxu1 %v110_v14 }
  0x14   :  { %450 = vmatprep.subr.bf16.mxu1 %v517_v1 }
  0x16   :  { %471 = vmatpush3.bf16.msra.mxu0 %v491_v11 }
  0x17   :  { %472 = vmatprep.subr.bf16.mxu0 %v517_v1 }
  0x1a   :  { %473 = vmatpush3.bf16.msra.mxu0 %v110_v14 }
  0xdc   :  { %v82_v15 = vpop.f32.mrb[0].mxu1  ;;  %v205_v16 = vpop.f32.mrb[0].mxu0 }
  0xdd   :  { %v430_v17 = vpop.f32.mrb[1].mxu1  ;;  %v448_v18 = vpop.f32.mrb[1].mxu0 }
  0xde   :  { %v85_v19 = vpop.f32.mrb[2].mxu1  ;;  %v208_v21 = vpop.f32.mrb[2].mxu0 }
  0xdf   :  { %v89_v20 = vpack.c.bf16 %v85_v19, %v82_v15  ;;  %v431_v22 = vpop.f32.mrb[3].mxu1  ;;  %v212_v23 = vpack.c.bf16 %v208_v21, %v205_v16  ;;  %v449_v24 = vpop.f32.mrb[3].mxu0 }
  0xe1   :  { %439 = vmatmul.mubr.msk.bf16.vlgmr.msra.gmra.mrb[4].mxu1 %vm105_vm3, %v89_v20 }
  0xe2   :  { %451 = vmatpush3.bf16.msra.mxu1 %v490_v9  ;;  %456 = vmatprep.mubr.msk.bf16.mxu1 %vm518_vm1, %v517_v1 }
  0xe3   :  { %452 = vmatprep.subr.bf16.mxu1 %v517_v1 }
  0xe4   :  { %v310_v25 = vpop.f32.mrb[4].mxu0 }
  0xe5   :  { %v466_v26 = vpop.f32.mrb[5].mxu0 }
  0xe6   :  { %453 = vmatpush3.bf16.msra.mxu1 %v491_v11  ;;  %v313_v27 = vpop.f32.mrb[6].mxu0 }
  0xe7   :  { %454 = vmatprep.subr.bf16.mxu1 %v517_v1  ;;  %v317_v28 = vpack.c.bf16 %v313_v27, %v310_v25  ;;  %v467_v29 = vpop.f32.mrb[7].mxu0 }
  0xe9   :  { %475 = vmatmul.mubr.msk.bf16.vlgmr.msra.gmra.mrb[8].mxu0 %vm105_vm3, %v317_v28 }
  0xea   :  { %455 = vmatpush3.bf16.msra.mxu1 %v110_v14 }
  0xed   :  { %457 = vmatmul.mubr.msk.bf16.vlgmr.msra.gmra.mrb[8].mxu1 %vm105_vm3, %v212_v23 }
 0x1b4   :  { %v146_v30 = vpop.f32.mrb[4].mxu1 }
 0x1b5   :  { %153 = vst [vmem:[#allocation2] sm:$0xff] %v146_v30  ;;  %v440_v31 = vpop.f32.mrb[5].mxu1 }
 0x1b6   :  { %v149_v32 = vpop.f32.mrb[6].mxu1 }
 0x1b7   :  { %154 = vst [vmem:[#allocation2 + $0x8] sm:$0xff] %v149_v32  ;;  %v441_v33 = vpop.f32.mrb[7].mxu1 }
 0x1bc   :  { %v355_v34 = vpop.f32.mrb[8].mxu0 }
 0x1bd   :  { %363 = vst [vmem:[#allocation2 + $0x20] sm:$0xff] %v355_v34  ;;  %v476_v35 = vpop.f32.mrb[9].mxu0 }
 0x1be   :  { %v358_v36 = vpop.f32.mrb[10].mxu0 }
 0x1bf   :  { %364 = vst [vmem:[#allocation2 + $0x28] sm:$0xff] %v358_v36  ;;  %v477_v38 = vpop.f32.mrb[11].mxu0 }
 0x1c0   :  { %v250_v37 = vpop.f32.mrb[8].mxu1 }
 0x1c1   :  { %258 = vst [vmem:[#allocation2 + $0x10] sm:$0xff] %v250_v37  ;;  %v458_v39 = vpop.f32.mrb[9].mxu1 }
 0x1c2   :  { %v253_v40 = vpop.f32.mrb[10].mxu1 }
 0x1c3   :  { %259 = vst [vmem:[#allocation2 + $0x18] sm:$0xff] %v253_v40  ;;  %v459_v41 = vpop.f32.mrb[11].mxu1 }
 0x1c4   :  { %504 = shalt.err (!%p501_p4)
}
 0x1c5   :  { %s505_s7 = scalar_lea.hbm %s624_s3, 768 }
 0x1c6   :  { %p506_p5 = scmp.ne.s32.totalorder %s624_s3, %s505_s7  ;;  %p509_p6 = scmp.lt.u32.totalorder %s505_s7, %s624_s3 }
 0x1c8   :  { %p511_p7 = pnand %p509_p6, %p506_p5 }
 0x1ca   :  { %514 = shalt.err (!%p511_p7)
}
 0x1cb   :  { %s520_s12 = smov 128   ;;  %s521_s13 = smov 8  }
 0x1cc   :  { %376 = dma.vmem_to_hbm [thread:$0]  %s371_s30, 768, %s624_s3, [#allocation3], %s520_s12, %s520_s12, %s521_s13  }
 0x1cd   :  { %515 = dma.done.wait [#allocation3], 768  }
 0x1ce   :  { %516 = vsyncadd [#allocation3], 4294966528 }
 0x1cf   :  { %380 = vsyncpa [#allocation3], 1 }

</bundles_post_ra>
